<compile_context>
chip_gen: v6e
topology: v6e:2x2x1
jax: 0.10.0
libtpu: 0.0.40
codegen_flags: <defaults>
</compile_context>

<pallas_src>
import jax
import jax.numpy as jnp
from jax.experimental import pallas as pl
from jax.experimental.pallas import tpu as pltpu


def _round_up(a, b):
    return ((a + b - 1) // b) * b


def _vmem_capacity_bytes():
    try:
        return int(pltpu.get_tpu_info().vmem_capacity_bytes)
    except Exception:
        return 64 * 1024 * 1024  # conservative default (v7x per-core VMEM)


# ---------------------------------------------------------------------------
# Kernels
# ---------------------------------------------------------------------------
def _swiglu_kernel_resident(x_ref, w1_ref, b1_ref, w3_ref, b3_ref, w2_ref,
                            b2_ref, o_ref):
    """Single hidden block (th == Hp): weights VMEM-resident, no accumulator."""
    cd = w1_ref.dtype
    x = x_ref[...].astype(cd)                       # cast in-kernel (free on VPU)
    h1 = jnp.dot(x, w1_ref[...], preferred_element_type=jnp.float32) + b1_ref[...]
    h3 = jnp.dot(x, w3_ref[...], preferred_element_type=jnp.float32) + b3_ref[...]
    # Gate product in the compute dtype (bf16 on v6e/v7x) after the f32 bias add.
    g = (h1 * jax.nn.sigmoid(h1)).astype(cd) * h3.astype(cd)
    o_ref[...] = (jnp.dot(g, w2_ref[...], preferred_element_type=jnp.float32)
                  + b2_ref[...]).astype(o_ref.dtype)
    # TODO(synk): nn.Dropout(p=0.0) is an identity in this forward; no kernel RNG.


def _swiglu_kernel_acc(x_ref, w1_ref, b1_ref, w3_ref, b3_ref, w2_ref, b2_ref,
                       o_ref, acc_ref):
    """Hidden dim tiled as a reduction axis; f32 accumulator + init/finalize."""
    k = pl.program_id(1)

    @pl.when(k == 0)
    def _init():
        acc_ref[...] = jnp.zeros_like(acc_ref)

    cd = w1_ref.dtype
    x = x_ref[...].astype(cd)
    # b1/b3 belong to this hidden block and must precede SiLU.
    h1 = jnp.dot(x, w1_ref[...], preferred_element_type=jnp.float32) + b1_ref[...]
    h3 = jnp.dot(x, w3_ref[...], preferred_element_type=jnp.float32) + b3_ref[...]
    g = (h1 * jax.nn.sigmoid(h1)).astype(cd) * h3.astype(cd)
    acc_ref[...] += jnp.dot(g, w2_ref[...], preferred_element_type=jnp.float32)

    @pl.when(k == pl.num_programs(1) - 1)
    def _finalize():
        # b2 folded in exactly once (not per hidden block).
        o_ref[...] = (acc_ref[...] + b2_ref[...]).astype(o_ref.dtype)


# ---------------------------------------------------------------------------
# Init-time weight prep (hoisted out of the per-call path)
# ---------------------------------------------------------------------------
def swiglu_prepare(w1, b1, w3, b3, w2, b2, *, compute_dtype=jnp.bfloat16):
    """Pad weights/biases to lane-dense 128-multiples and cast once."""
    dim, hidden = w1.shape
    Dp = _round_up(dim, 128)
    Hp = _round_up(hidden, 128)
    cd = compute_dtype
    return dict(
        w1=jnp.pad(w1, ((0, Dp - dim), (0, Hp - hidden))).astype(cd),
        b1=jnp.pad(b1, (0, Hp - hidden)).reshape(1, Hp).astype(jnp.float32),
        w3=jnp.pad(w3, ((0, Dp - dim), (0, Hp - hidden))).astype(cd),
        b3=jnp.pad(b3, (0, Hp - hidden)).reshape(1, Hp).astype(jnp.float32),
        w2=jnp.pad(w2, ((0, Hp - hidden), (0, Dp - dim))).astype(cd),
        b2=jnp.pad(b2, (0, Dp - dim)).reshape(1, Dp).astype(jnp.float32),
        dim=dim, hidden=hidden, Dp=Dp, Hp=Hp, compute_dtype=cd,
    )


# ---------------------------------------------------------------------------
# Tile selection (per TPU generation, VMEM-budget aware)
# ---------------------------------------------------------------------------
def _select_tiles(M, Dp, Hp, x_it, w_it, o_it, tm_req, th_req, vmem_cap):
    budget = max(vmem_cap - 8 * (1 << 20), 24 * (1 << 20))

    if tm_req is None:
        # v5e/v6e (128 MiB VMEM): tm~768 reaches the ~650 FLOPs/B weight-stream
        # roofline; v7x (64 MiB VMEM, ~310 FLOPs/B): tm~512 keeps tiles resident.
        tm_req = 768 if vmem_cap >= (100 << 20) else 512

    Mr = _round_up(M, 8)
    if Mr <= tm_req:
        # Small-M (decode): keep >=2 row tiles when possible so the "parallel"
        # row axis can shard across v7x's 2 TensorCores.
        tm = Mr if Mr <= 8 else max(8, _round_up((Mr + 1) // 2, 8))
    else:
        tm = _round_up(tm_req, 8)

    def est(tm_, th_):
        acc = tm_ * Dp * 4 if th_ < Hp else 0       # f32 accumulator scratch
        return (2 * tm_ * Dp * x_it                 # x tile (double buffered)
                + 2 * 2 * Dp * th_ * w_it           # W1, W3 blocks
                + 2 * th_ * Dp * w_it               # W2 block
                + 2 * (2 * th_ + Dp) * 4            # biases (f32)
                + 2 * tm_ * Dp * o_it               # output tile
                + acc
                + 4 * tm_ * th_ * 4)                # h1/h3/gate temporaries + headroom

    def th_candidates():
        if th_req is not None:
            t0 = min(_round_up(th_req, 128), Hp)
            cands = ([Hp] if t0 >= Hp else [])
            cands += [t for t in range(t0, 127, -128) if Hp % t == 0]
        else:
            # Prefer th == Hp: constant weight index maps -> weights DMA'd once
            # and VMEM-resident across every row tile (1x weight HBM traffic).
            cands = [Hp] + [t for t in range(min(Hp, 1024), 127, -128) if Hp % t == 0]
        seen, out = set(), []
        for t in cands:
            if t not in seen:
                seen.add(t)
                out.append(t)
        return out

    while True:
        for t in th_candidates():
            e = est(tm, t)
            if e <= budget:
                return tm, t, e
        if tm <= 8:
            return tm, 128, est(tm, 128)
        tm = max(8, _round_up(tm // 2, 8))


# ---------------------------------------------------------------------------
# Per-call wrapper
# ---------------------------------------------------------------------------
def swiglu_pallas(x, params, *, tm=None, th=None):
    """x: (..., dim); params: output of swiglu_prepare()."""
    dim, Dp, Hp = params["dim"], params["Dp"], params["Hp"]
    cd = params["compute_dtype"]
    assert x.shape[-1] == dim
    lead = x.shape[:-1]
    M = 1
    for s in lead:
        M *= int(s)
    out_dtype = x.dtype

    x_it = jnp.dtype(x.dtype).itemsize
    w_it = jnp.dtype(cd).itemsize
    o_it = jnp.dtype(out_dtype).itemsize

    vmem_cap = _vmem_capacity_bytes()
    tm, th, est_bytes = _select_tiles(M, Dp, Hp, x_it, w_it, o_it, tm, th, vmem_cap)
    Mp = _round_up(M, tm)
    kh = Hp // th
    grid = (Mp // tm, kh)

    x2d = x.reshape(M, dim)
    pad_m, pad_d = Mp - M, Dp - dim
    if pad_m or pad_d:
        # Pad only when required; the compute-dtype cast happens inside the
        # kernel, so there is no separate f32-read/bf16-write activation pass.
        x2d = jnp.pad(x2d, ((0, pad_m), (0, pad_d)))

    if kh == 1:
        kernel, scratch = _swiglu_kernel_resident, []
    else:
        kernel, scratch = _swiglu_kernel_acc, [pltpu.VMEM((tm, Dp), jnp.float32)]

    # est already models double buffering; cap under physical VMEM - headroom.
    budget = max(vmem_cap - 8 * (1 << 20), 24 * (1 << 20))
    vmem_limit = int(min(max(est_bytes, 32 * (1 << 20)), budget))

    cost = pl.CostEstimate(
        flops=6 * Mp * Dp * Hp,
        transcendentals=Mp * Hp,
        bytes_accessed=int(Mp * Dp * (x_it + o_it) + 3 * Dp * Hp * w_it
                           + (2 * Hp + Dp) * 4),
    )

    out = pl.pallas_call(
        kernel,
        out_shape=jax.ShapeDtypeStruct((Mp, Dp), out_dtype),
        grid_spec=pltpu.PrefetchScalarGridSpec(
            num_scalar_prefetch=0,
            grid=grid,
            in_specs=[
                pl.BlockSpec((tm, Dp), lambda i, k: (i, 0)),   # x row tile (const over k)
                pl.BlockSpec((Dp, th), lambda i, k: (0, k)),   # W1 hidden block
                pl.BlockSpec((1, th), lambda i, k: (0, k)),    # b1 hidden block
                pl.BlockSpec((Dp, th), lambda i, k: (0, k)),   # W3 hidden block
                pl.BlockSpec((1, th), lambda i, k: (0, k)),    # b3 hidden block
                pl.BlockSpec((th, Dp), lambda i, k: (k, 0)),   # W2 hidden block
                pl.BlockSpec((1, Dp), lambda i, k: (0, 0)),    # b2 (finalize only)
            ],
            out_specs=pl.BlockSpec((tm, Dp), lambda i, k: (i, 0)),
            scratch_shapes=scratch,
        ),
        compiler_params=pltpu.CompilerParams(
            dimension_semantics=("parallel", "arbitrary"),
            vmem_limit_bytes=vmem_limit,
        ),
        cost_estimate=cost,
    )(x2d, params["w1"], params["b1"], params["w3"], params["b3"],
      params["w2"], params["b2"])

    if pad_m or pad_d:
        out = out[:M, :dim]
    return out.reshape(*lead, dim)


def swiglu_reference(x, w1, b1, w3, b3, w2, b2):
    h1 = x @ w1 + b1
    h3 = x @ w3 + b3
    g = jax.nn.silu(h1) * h3
    return g @ w2 + b2


if __name__ == "__main__":
    # Module config: dim=64, hidden_dim=96, multiple_of=4
    #   -> hidden = 4 * ((2*96//3 + 3)//4) = 64
    dim = 64
    hidden_dim_arg = 96
    multiple_of = 4
    hidden = int(multiple_of * ((2 * hidden_dim_arg // 3 + multiple_of - 1) // multiple_of))

    B, S = 2, 8
    key = jax.random.PRNGKey(0)
    kx, k1, kb1, k3, kb3, k2, kb2 = jax.random.split(key, 7)

    x = jax.random.normal(kx, (B, S, dim), dtype=jnp.float32)
    # Deterministic synthetic parameters, stored as (in, out) / (out,).
    w1 = jax.random.normal(k1, (dim, hidden), dtype=jnp.float32) * 0.05
    b1 = jax.random.normal(kb1, (hidden,), dtype=jnp.float32) * 0.01
    w3 = jax.random.normal(k3, (dim, hidden), dtype=jnp.float32) * 0.05
    b3 = jax.random.normal(kb3, (hidden,), dtype=jnp.float32) * 0.01
    w2 = jax.random.normal(k2, (hidden, dim), dtype=jnp.float32) * 0.05
    b2 = jax.random.normal(kb2, (dim,), dtype=jnp.float32) * 0.01

    ref = swiglu_reference(x, w1, b1, w3, b3, w2, b2)

    # Init-time weight prep (hoisted out of the per-call path).
    params_f32 = swiglu_prepare(w1, b1, w3, b3, w2, b2, compute_dtype=jnp.float32)
    params_bf16 = swiglu_prepare(w1, b1, w3, b3, w2, b2, compute_dtype=jnp.bfloat16)

    # Tight check of the blocked/padded math (f32 MXU, weight-resident path).
    out_f32 = jax.block_until_ready(swiglu_pallas(x, params_f32))
    assert out_f32.shape == (B, S, dim)
    assert jnp.allclose(out_f32, ref, atol=2e-4, rtol=2e-4), "f32 mismatch vs reference"

    # Perf-default bf16 MXU path (looser tolerance for bf16 operand rounding).
    out_bf16 = jax.block_until_ready(swiglu_pallas(x, params_bf16))
    assert out_bf16.shape == (B, S, dim)
    assert jnp.allclose(out_bf16, ref, atol=5e-2, rtol=5e-2), "bf16 mismatch vs reference"

    # Exercise the hidden-reduction (accumulator) path and the no-pad fast path:
    # dim is a multiple of 128 and th=128 forces a k grid axis of size 4.
    dim2, hidden2 = 128, 512
    B2, S2 = 2, 64
    kx2, ka, kb, kc, kd, ke, kf = jax.random.split(jax.random.PRNGKey(1), 7)
    x2 = jax.random.normal(kx2, (B2, S2, dim2), dtype=jnp.float32)
    w1b = jax.random.normal(ka, (dim2, hidden2), dtype=jnp.float32) * 0.05
    b1b = jax.random.normal(kb, (hidden2,), dtype=jnp.float32) * 0.01
    w3b = jax.random.normal(kc, (dim2, hidden2), dtype=jnp.float32) * 0.05
    b3b = jax.random.normal(kd, (hidden2,), dtype=jnp.float32) * 0.01
    w2b = jax.random.normal(ke, (hidden2, dim2), dtype=jnp.float32) * 0.05
    b2b = jax.random.normal(kf, (dim2,), dtype=jnp.float32) * 0.01
    ref2 = swiglu_reference(x2, w1b, b1b, w3b, b3b, w2b, b2b)
    params2 = swiglu_prepare(w1b, b1b, w3b, b3b, w2b, b2b, compute_dtype=jnp.float32)
    out2 = jax.block_until_ready(swiglu_pallas(x2, params2, th=128))
    assert out2.shape == (B2, S2, dim2)
    assert jnp.allclose(out2, ref2, atol=2e-3, rtol=2e-3), "multi-block mismatch vs reference"

    print("KERNEL_OK")
</pallas_src>

<mosaic_0001>
module attributes {stable_mosaic.version = 11 : i64} {
  func.func @_swiglu_kernel_resident(%arg0: i32, %arg1: i32, %arg2: memref<8x128xf32, #tpu.memory_space<vmem>>, %arg3: memref<128x128xf32, #tpu.memory_space<vmem>>, %arg4: memref<1x128xf32, #tpu.memory_space<vmem>>, %arg5: memref<128x128xf32, #tpu.memory_space<vmem>>, %arg6: memref<1x128xf32, #tpu.memory_space<vmem>>, %arg7: memref<128x128xf32, #tpu.memory_space<vmem>>, %arg8: memref<1x128xf32, #tpu.memory_space<vmem>>, %arg9: memref<8x128xf32, #tpu.memory_space<vmem>>) attributes {dimension_semantics = [#tpu.dimension_semantics<parallel>, #tpu.dimension_semantics<arbitrary>], iteration_bounds = array<i64: 2, 1>, scalar_prefetch = 0 : i64, scratch_operands = 0 : i64, tpu.core_type = #tpu.core_type<tc>, window_params = [{transform_indices = @transform_0, window_bounds = array<i64: 8, 128>}, {transform_indices = @transform_1, window_bounds = array<i64: 128, 128>}, {transform_indices = @transform_2, window_bounds = array<i64: 1, 128>}, {transform_indices = @transform_3, window_bounds = array<i64: 128, 128>}, {transform_indices = @transform_4, window_bounds = array<i64: 1, 128>}, {transform_indices = @transform_5, window_bounds = array<i64: 128, 128>}, {pipeline_mode = #tpu.pipeline_mode<synchronous>, transform_indices = @transform_6, window_bounds = array<i64: 1, 128>}, {transform_indices = @transform_7, window_bounds = array<i64: 8, 128>}]} {
    %c0 = arith.constant 0 : index
    %c0_0 = arith.constant 0 : index
    %0 = vector.load %arg2[%c0, %c0_0] : memref<8x128xf32, #tpu.memory_space<vmem>>, vector<8x128xf32>
    %c0_1 = arith.constant 0 : index
    %c0_2 = arith.constant 0 : index
    %1 = vector.load %arg3[%c0_1, %c0_2] : memref<128x128xf32, #tpu.memory_space<vmem>>, vector<128x128xf32>
    %cst = arith.constant dense<0.000000e+00> : vector<8x128xf32>
    %2 = tpu.matmul %0, %1, %cst {dimension_numbers = #tpu.dot_dimension_numbers<[1], [0], [0], [1], [0, 0, 1, 1], [], []>} : vector<8x128xf32>, vector<128x128xf32>, vector<8x128xf32> -> vector<8x128xf32>
    %c0_3 = arith.constant 0 : index
    %c0_4 = arith.constant 0 : index
    %3 = vector.load %arg4[%c0_3, %c0_4] : memref<1x128xf32, #tpu.memory_space<vmem>>, vector<1x128xf32>
    %4 = vector.broadcast %3 : vector<1x128xf32> to vector<8x128xf32>
    %5 = arith.addf %2, %4 : vector<8x128xf32>
    %c0_5 = arith.constant 0 : index
    %c0_6 = arith.constant 0 : index
    %6 = vector.load %arg5[%c0_5, %c0_6] : memref<128x128xf32, #tpu.memory_space<vmem>>, vector<128x128xf32>
    %cst_7 = arith.constant dense<0.000000e+00> : vector<8x128xf32>
    %7 = tpu.matmul %0, %6, %cst_7 {dimension_numbers = #tpu.dot_dimension_numbers<[1], [0], [0], [1], [0, 0, 1, 1], [], []>} : vector<8x128xf32>, vector<128x128xf32>, vector<8x128xf32> -> vector<8x128xf32>
    %c0_8 = arith.constant 0 : index
    %c0_9 = arith.constant 0 : index
    %8 = vector.load %arg6[%c0_8, %c0_9] : memref<1x128xf32, #tpu.memory_space<vmem>>, vector<1x128xf32>
    %9 = vector.broadcast %8 : vector<1x128xf32> to vector<8x128xf32>
    %10 = arith.addf %7, %9 : vector<8x128xf32>
    %11 = arith.negf %5 : vector<8x128xf32>
    %12 = math.exp %11 : vector<8x128xf32>
    %cst_10 = arith.constant 1.000000e+00 : f32
    %13 = vector.broadcast %cst_10 : f32 to vector<8x128xf32>
    %14 = arith.addf %13, %12 : vector<8x128xf32>
    %15 = arith.divf %13, %14 : vector<8x128xf32>
    %16 = arith.mulf %5, %15 : vector<8x128xf32>
    %17 = arith.mulf %16, %10 : vector<8x128xf32>
    %c0_11 = arith.constant 0 : index
    %c0_12 = arith.constant 0 : index
    %18 = vector.load %arg7[%c0_11, %c0_12] : memref<128x128xf32, #tpu.memory_space<vmem>>, vector<128x128xf32>
    %cst_13 = arith.constant dense<0.000000e+00> : vector<8x128xf32>
    %19 = tpu.matmul %17, %18, %cst_13 {dimension_numbers = #tpu.dot_dimension_numbers<[1], [0], [0], [1], [0, 0, 1, 1], [], []>} : vector<8x128xf32>, vector<128x128xf32>, vector<8x128xf32> -> vector<8x128xf32>
    %c0_14 = arith.constant 0 : index
    %c0_15 = arith.constant 0 : index
    %20 = vector.load %arg8[%c0_14, %c0_15] : memref<1x128xf32, #tpu.memory_space<vmem>>, vector<1x128xf32>
    %21 = vector.broadcast %20 : vector<1x128xf32> to vector<8x128xf32>
    %22 = arith.addf %19, %21 : vector<8x128xf32>
    %c0_16 = arith.constant 0 : index
    %c0_17 = arith.constant 0 : index
    %23 = vector.load %arg9[%c0_16, %c0_17] : memref<8x128xf32, #tpu.memory_space<vmem>>, vector<8x128xf32>
    tpu.vector_store %arg9[%c0_16, %c0_17], %22 {strides = array<i32>} : memref<8x128xf32, #tpu.memory_space<vmem>>, vector<8x128xf32>,
    return
  }
  func.func @transform_0(%arg0: i32, %arg1: i32) -> (i32, i32) {
    %c0_i32 = arith.constant 0 : i32
    %c0_i32_0 = arith.constant 0 : i32
    return %arg0, %c0_i32 : i32, i32
  }
  func.func @transform_1(%arg0: i32, %arg1: i32) -> (i32, i32) {
    %c0_i32 = arith.constant 0 : i32
    %c0_i32_0 = arith.constant 0 : i32
    return %c0_i32, %arg1 : i32, i32
  }
  func.func @transform_2(%arg0: i32, %arg1: i32) -> (i32, i32) {
    %c0_i32 = arith.constant 0 : i32
    %c0_i32_0 = arith.constant 0 : i32
    return %c0_i32, %arg1 : i32, i32
  }
  func.func @transform_3(%arg0: i32, %arg1: i32) -> (i32, i32) {
    %c0_i32 = arith.constant 0 : i32
    %c0_i32_0 = arith.constant 0 : i32
    return %c0_i32, %arg1 : i32, i32
  }
  func.func @transform_4(%arg0: i32, %arg1: i32) -> (i32, i32) {
    %c0_i32 = arith.constant 0 : i32
    %c0_i32_0 = arith.constant 0 : i32
    return %c0_i32, %arg1 : i32, i32
  }
  func.func @transform_5(%arg0: i32, %arg1: i32) -> (i32, i32) {
    %c0_i32 = arith.constant 0 : i32
    %c0_i32_0 = arith.constant 0 : i32
    return %arg1, %c0_i32 : i32, i32
  }
  func.func @transform_6(%arg0: i32, %arg1: i32) -> (i32, i32) {
    %c0_i32 = arith.constant 0 : i32
    %c0_i32_0 = arith.constant 0 : i32
    %c0_i32_1 = arith.constant 0 : i32
    return %c0_i32, %c0_i32_0 : i32, i32
  }
  func.func @transform_7(%arg0: i32, %arg1: i32) -> (i32, i32) {
    %c0_i32 = arith.constant 0 : i32
    %c0_i32_0 = arith.constant 0 : i32
    return %arg0, %c0_i32 : i32, i32
  }
}

</mosaic_0001>

<bundles_post_ra>
// kernel: tpu_custom_call.1
= control target key start
LH: loop header
LB: loop body
LE: loop exit
PB: predicated region body
PF: predicated region fallthrough
CT: control target
= control target key end

     0   :  { %s1630_s0 = inlined_call_operand.hbm [shape: f32[16,128], index: 0, kind: input, shape index: {}]   ;;  %s1631_s1 = inlined_call_operand.hbm [shape: f32[128,128], index: 1, kind: input, shape index: {}]   ;;  %s1632_s2 = inlined_call_operand.vmem [shape: f32[1,128], index: 2, kind: input, shape index: {}]   ;;  %s1633_s3 = inlined_call_operand.hbm [shape: f32[128,128], index: 3, kind: input, shape index: {}]   ;;  %s1634_s4 = inlined_call_operand.vmem [shape: f32[1,128], index: 4, kind: input, shape index: {}]   ;;  %s1635_s5 = inlined_call_operand.hbm [shape: f32[128,128], index: 5, kind: input, shape index: {}]   ;;  %s1636_s6 = inlined_call_operand.vmem [shape: f32[1,128], index: 6, kind: input, shape index: {}]   ;;  %s1637_s7 = inlined_call_operand.hbm [shape: f32[16,128], index: 7, kind: output, shape index: {}]  }
   0x1   :  { %1642 = sst [smem:[#allocation15_spill]] %s1631_s1 }
   0x2   :  { %1643 = sst [smem:[#allocation16_spill]] %s1633_s3 }
   0x3   :  { %1644 = sst [smem:[#allocation17_spill]] %s1635_s5 }
   0x4   :  { %12 = vsyncpa [#allocation3], 0 }
   0x5   :  { %14 = vsyncpa [#allocation3 + $0x1], 0 }
   0x6   :  { %15 = vsyncpa [#allocation6], 0 }
   0x7   :  { %16 = vsyncpa [#allocation9], 0 }
   0x8   :  { %17 = vsyncpa [#allocation4], 0 }
   0x9   :  { %19 = vsyncpa [#allocation4 + $0x1], 0  ;;  %s1368_s24 = smov 0   ;;  %s1370_s25 = smov 0  }
   0xa   :  { %s1372_s26 = smov 0   ;;  %s1374_s27 = smov 0  }
   0xb   :  { %s1376_s28 = smov 0   ;;  %s1378_s29 = smov 0  }
   0xc LB: > { %s841_s30 = sadd.s32 4294967295, %s1317_s29   ;;  %s842_s8 = sadd.s32 4294967294, %s1317_s29   ;;  %s1317_s29 = sphi %s1378_s29, %s25_s29   ;;  %s1313_s28 = sphi %s1376_s28, %s1665_s28   ;;  %s1309_s27 = sphi %s1374_s27, %s1664_s27   ;;  %s1305_s26 = sphi %s1372_s26, %s1663_s26   ;;  %s1301_s25 = sphi %s1370_s25, %s1662_s25   ;;  %s1297_s24 = sphi %s1368_s24, %s1661_s24  }
   0xd   : > { %p57_p0 = scmp.ne.s32.totalorder %s1301_s25, %s1297_s24  ;;  %p1402_p1 = scmp.eq.s32.totalorder %s841_s30, 0 }
   0xe   : > { %p1406_p2 = scmp.eq.s32.totalorder %s841_s30, 1  ;;  %p238_p3 = scmp.eq.s32.totalorder %s842_s8, 1 }
   0xf   : > { %s1645_s9 = scalar_select %p1402_p1, 1, 0 }
  0x10   : > { %p1412_p4 = por %p1402_p1, %p57_p0  ;;  %p843_p5 = scmp.ge.s32.totalorder %s1317_s29, 1 }
  0x11   : > { %p1417_p6 = por %p238_p3, %p57_p0  ;;  %p245_p7 = scmp.lt.s32.totalorder %s1317_s29, 3 }
  0x12   : > { %s1647_s11 = scalar_select %p1412_p4, 1, 0 }
  0x13   : > { %s1648_s12 = scalar_select %p1417_p6, 1, 0 }
  0x14   : > { %p1422_p8 = pnand %p843_p5, %p245_p7  ;;  %s1319_s14 = smov [#allocation5]  }
  0x15   : > { %s259_s15 = sshll.u32 %s1319_s14, 4  ;;  %s1320_s17 = smov [#allocation7]   ;;  %s260_s15 = int_to_ptr.vmem [resolvable:$true] %s259_s15 }
  0x16   : > { %s1649_s13 = scalar_select %p1422_p8, 1, 0 }
  0x17   : > { %p1038_p9 = pneg %p1422_p8  ;;  %s280_s18 = sshll.u32 %s1320_s17, 4  ;;  %s281_s18 = int_to_ptr.vmem [resolvable:$true] %s280_s18 }
  0x18   : > { %s1321_s19 = smov [#allocation8]   ;;  %s1134_s21 = scalar_lea.vmem %s260_s15, 2048 }
  0x19   : > { %p1431_p11 = pnand %p1038_p9, %p1402_p1  ;;  %s302_s20 = sshll.u32 %s1321_s19, 4  ;;  %s303_s20 = int_to_ptr.vmem [resolvable:$true] %s302_s20 }
  0x1a   : > { %p1135_p13 = scmp.ne.s32.totalorder %s260_s15, %s1134_s21  ;;  %p1142_p5 = scmp.lt.s32.totalorder %s260_s15, %s260_s15 }
  0x1b   : > { %p1125_p12 = pneg %p1431_p11  ;;  %p1143_p7 = scmp.lt.s32.totalorder %s1134_s21, %s1134_s21 }
  0x1d   : > { %p1137_p0 = pnand %p1135_p13, %p1125_p12  ;;  %p1144_p9 = por %p1143_p7, %p1142_p5 }
  0x1f   : > { %p1138_p3 = pneg %p1137_p0 }
  0x21   : > { %p1145_p10 = pnand %p1144_p9, %p1138_p3 }
  0x23   : > { %1148 = shalt.err (!%p1145_p10)
}
  0x24   : > { %s1322_s22 = smov 128   ;;  %s1323_s23 = smov 8  }
  0x25   : > { %s1651_s1 = sld [smem:[#allocation15_spill]]  ;;  %s1160_s14 = scalar_lea.vmem %s281_s18, 2048 }
  0x26   : > { %p1161_p6 = scmp.ne.s32.totalorder %s281_s18, %s1160_s14  ;;  %p1168_p1 = scmp.lt.s32.totalorder %s281_s18, %s281_s18 }
  0x27   : > { %p1169_p4 = scmp.lt.s32.totalorder %s1160_s14, %s1160_s14 }
  0x28   : > { %p1163_p13 = pnand %p1161_p6, %p1125_p12 }
  0x29   : > { %p1170_p5 = por %p1169_p4, %p1168_p1 }
  0x2a   : > { %p1164_p0 = pneg %p1163_p13 }
  0x2b   : > { %1041 = dma.hbm_to_vmem [thread:$0]  (!%p1431_p11), %s1651_s1, 2048, %s260_s15, [#allocation6], %s1322_s22, %s1322_s22, %s1323_s23  }
  0x2c   : > { %p1171_p3 = pnand %p1170_p5, %p1164_p0 }
  0x2e   : > { %1174 = shalt.err (!%p1171_p3)
}
  0x2f   : > { %s1652_s3 = sld [smem:[#allocation16_spill]]  ;;  %s1186_s15 = scalar_lea.vmem %s303_s20, 2048 }
  0x30   : > { %p1187_p10 = scmp.ne.s32.totalorder %s303_s20, %s1186_s15  ;;  %p1194_p9 = scmp.lt.s32.totalorder %s303_s20, %s303_s20 }
  0x31   : > { %p1195_p13 = scmp.lt.s32.totalorder %s1186_s15, %s1186_s15 }
  0x32   : > { %p1189_p7 = pnand %p1187_p10, %p1125_p12 }
  0x33   : > { %p1196_p8 = por %p1195_p13, %p1194_p9 }
  0x34   : > { %p1190_p6 = pneg %p1189_p7 }
  0x35   : > { %1044 = dma.hbm_to_vmem [thread:$0]  (!%p1431_p11), %s1652_s3, 2048, %s281_s18, [#allocation6], %s1322_s22, %s1322_s22, %s1323_s23  }
  0x36   : > { %p1197_p1 = pnand %p1196_p8, %p1190_p6 }
  0x38   : > { %1200 = shalt.err (!%p1197_p1)
}
  0x39   : > { %s1653_s5 = sld [smem:[#allocation17_spill]]  ;;  %s44_s18 = sadd.s32 1, %s1305_s26 }
  0x3a   : > { %s37_s8 = sadd.s32 1, %s1313_s28  ;;  %p51_p4 = scmp.ne.s32.totalorder %s1305_s26, %s1301_s25 }
  0x3b   : > { %p39_p8 = scmp.ge.s32.totalorder %s37_s8, 2  ;;  %p52_p12 = scmp.eq.s32.totalorder %s1317_s29, 0 }
  0x3c   : > { %p1468_p0 = por %p1406_p2, %p51_p4  ;;  %p1059_p5 = scmp.lt.s32.totalorder %s1317_s29, 2 }
  0x3d   : > { %s1667_s8 = smov (%p39_p8, %s37_s8), 0  ;;  %p53_p3 = por %p52_p12, %p51_p4 }
  0x3e   : > { %s319_s14 = sand.u32 1, %s1305_s26   ;;  %s41_s17 = ssub.s32 %s1313_s28, %s1667_s8 }
  0x3f   : > { %1047 = dma.hbm_to_vmem [thread:$0]  (!%p1431_p11), %s1653_s5, 2048, %s303_s20, [#allocation9], %s1322_s22, %s1322_s22, %s1323_s23  }
  0x40   : > { %p42_p10 = scmp.eq.s32.totalorder %s41_s17, 0  ;;  %s850_s20 = sshll.u32 %s319_s14, 3 }
  0x41   : > { %s851_s22 = sshll.u32 %s1313_s28, 7  ;;  %s323_s21 = scalar_lea.vmem [#allocation2], %s850_s20 }
  0x42   : > { %s1480_s23 = scalar_select %p42_p10, %s1305_s26, %s44_s18  }
  0x43   : > { %s328_s10 = scalar_lea.hbm %s1630_s0, %s851_s22  ;;  %s330_s30 = sshll.u32 %s323_s21, 4  ;;  %s331_s30 = int_to_ptr.vmem [resolvable:$true] %s330_s30 }
  0x44   : > { %p1487_p2 = pnand %p1059_p5, %p53_p3  ;;  %s320_s3 = scalar_lea.sflag [#allocation3], %s319_s14 }
  0x45   : > { %s1214_s17 = scalar_lea.vmem %s331_s30, 128  ;;  %s1324_s18 = smov [#allocation2]  }
  0x46   : > { %p1203_p11 = pneg %p1487_p2  ;;  %p1215_p7 = scmp.ne.s32.totalorder %s331_s30, %s1214_s17 }
  0x47   : > { %s1219_s5 = sshll.u32 %s1324_s18, 4  ;;  %s1220_s5 = int_to_ptr.vmem [resolvable:$false] %s1219_s5 }
  0x48   : > { %p1217_p6 = pnand %p1215_p7, %p1203_p11  ;;  %s1221_s22 = scalar_lea.vmem %s1220_s5, 256 }
  0x49   : > { %p1222_p13 = scmp.lt.s32.totalorder %s331_s30, %s1220_s5  ;;  %p1223_p1 = scmp.lt.s32.totalorder %s1221_s22, %s1214_s17 }
  0x4a   : > { %p1218_p9 = pneg %p1217_p6 }
  0x4b   : > { %p1224_p4 = por %p1223_p1, %p1222_p13 }
  0x4d   : > { %p1225_p8 = pnand %p1224_p4, %p1218_p9 }
  0x4f   : > { %1228 = shalt.err (!%p1225_p8)
}
  0x50   : > { %1051 = dma.hbm_to_vmem [thread:$0]  (!%p1487_p2), %s328_s10, 128, %s331_s30, %s320_s3  }
  0x51   : > { %p1656_p12 = scmp.ne.s32.totalorder %s1649_s13, 0 }
  0x52   : > { %s1498_s14 = sand.u32 (!%p1656_p12), 1, %s1301_s25   ;;  %p1657_p5 = scmp.ne.s32.totalorder (!%p1656_p12), %s1647_s11, 0 }
  0x53   : > { %339 = sbr.rel (%p1656_p12) target bundleno = 567 (0x237), region = 48  ;;  %s853_s20 = sshll.u32 (!%p1656_p12), %s1498_s14, 3 }
  0x54   : > { %s342_s19 = scalar_lea.sflag (!%p1656_p12), [#allocation3], %s1498_s14  ;;  %s1504_s5 = scalar_lea.vmem (!%p1656_p12), [#allocation2], %s853_s20 }
  0x58   : > { %1280 = dma.done.wait (%p1657_p5), %s342_s19, 128  }
  0x59   : > { %1282 = vsyncadd (%p1657_p5), %s342_s19, 4294967168  ;;  %p1658_p3 = scmp.ne.s32.totalorder %s1645_s9, 0 }
  0x5b   : > { %1284 = dma.done.wait (%p1658_p3), [#allocation6], 4096  }
  0x5c   : > { %1286 = vsyncadd (%p1658_p3), [#allocation6], 4294963200 }
  0x5d   : > { %1288 = dma.done.wait (%p1658_p3), [#allocation9], 2048  }
  0x5e   : > { %1290 = vsyncadd (%p1658_p3), [#allocation9], 4294965248  ;;  %v1325_v0 = vmov 0.0   ;;  %vm1326_vm0 = vmmov 0   ;;  %v417_v1 = vld [vmem:[#allocation5 + $0x78] sm:$0xff]  ;;  %v416_v2 = vld [vmem:[#allocation5 + $0x70] sm:$0xff] }
  0x5f   : > { %917 = vmatprep.subr.mxu0 %v1325_v0  ;;  %949 = vmatprep.mubr.msk.f32.mxu0 %vm1326_vm0, %v1325_v0  ;;  %v415_v3 = vld [vmem:[#allocation5 + $0x68] sm:$0xff]  ;;  %v414_v4 = vld [vmem:[#allocation5 + $0x60] sm:$0xff]  ;;  %v510_v5 = vld [vmem:[#allocation7 + $0x78] sm:$0xff]  ;;  %s863_s10 = sshll.u32 %s1309_s27, 7  ;;  %s393_s21 = scalar_lea.vmem [#allocation10], %s853_s20 }
  0x60   : > { %952 = vmatprep.subr.mxu1 %v1325_v0  ;;  %984 = vmatprep.mubr.msk.f32.mxu1 %vm1326_vm0, %v1325_v0  ;;  %v413_v6 = vld [vmem:[#allocation5 + $0x58] sm:$0xff]  ;;  %v509_v7 = vld [vmem:[#allocation7 + $0x70] sm:$0xff]  ;;  %v508_v8 = vld [vmem:[#allocation7 + $0x68] sm:$0xff]  ;;  %s704_s30 = sshll.u32 %s393_s21, 4  ;;  %s1588_s22 = scalar_lea.hbm %s1637_s7, %s863_s10  ;;  %s705_s30 = int_to_ptr.vmem [resolvable:$true] %s704_s30 }
  0x61   : > { %918 = vmatpush3.msra.mxu0 %v417_v1  ;;  %953 = vmatpush3.msra.mxu1 %v510_v5  ;;  %v412_v9 = vld [vmem:[#allocation5 + $0x50] sm:$0xff]  ;;  %v507_v10 = vld [vmem:[#allocation7 + $0x60] sm:$0xff]  ;;  %v411_v11 = vld [vmem:[#allocation5 + $0x48] sm:$0xff]  ;;  %s691_s19 = scalar_lea.sflag [#allocation4], %s1498_s14  ;;  %s1327_s27 = smov [#allocation10]  }
  0x62   : > { %919 = vmatprep.subr.mxu0 %v1325_v0  ;;  %954 = vmatprep.subr.mxu1 %v1325_v0  ;;  %v506_v12 = vld [vmem:[#allocation7 + $0x58] sm:$0xff]  ;;  %v410_v13 = vld [vmem:[#allocation5 + $0x40] sm:$0xff]  ;;  %v505_v14 = vld [vmem:[#allocation7 + $0x50] sm:$0xff]  ;;  %s1233_s1 = sshll.u32 %s1327_s27, 4  ;;  %s1234_s1 = int_to_ptr.vmem [resolvable:$false] %s1233_s1 }
  0x63   : > { %920 = vmatpush3.msra.mxu0 %v416_v2  ;;  %955 = vmatpush3.msra.mxu1 %v509_v7  ;;  %v409_v15 = vld [vmem:[#allocation5 + $0x38] sm:$0xff]  ;;  %v504_v16 = vld [vmem:[#allocation7 + $0x48] sm:$0xff]  ;;  %v408_v17 = vld [vmem:[#allocation5 + $0x30] sm:$0xff]  ;;  %s1235_s20 = scalar_lea.vmem %s1234_s1, 256  ;;  %p1236_p7 = scmp.lt.s32.totalorder %s705_s30, %s1234_s1 }
  0x64   : > { %921 = vmatprep.subr.mxu0 %v1325_v0  ;;  %956 = vmatprep.subr.mxu1 %v1325_v0  ;;  %v503_v18 = vld [vmem:[#allocation7 + $0x40] sm:$0xff]  ;;  %v407_v19 = vld [vmem:[#allocation5 + $0x28] sm:$0xff]  ;;  %v502_v20 = vld [vmem:[#allocation7 + $0x38] sm:$0xff] }
  0x65   : > { %922 = vmatpush3.msra.mxu0 %v415_v3  ;;  %957 = vmatpush3.msra.mxu1 %v508_v8  ;;  %v406_v21 = vld [vmem:[#allocation5 + $0x20] sm:$0xff]  ;;  %v501_v22 = vld [vmem:[#allocation7 + $0x30] sm:$0xff]  ;;  %v405_v23 = vld [vmem:[#allocation5 + $0x18] sm:$0xff] }
  0x66   : > { %923 = vmatprep.subr.mxu0 %v1325_v0  ;;  %958 = vmatprep.subr.mxu1 %v1325_v0  ;;  %v500_v24 = vld [vmem:[#allocation7 + $0x28] sm:$0xff]  ;;  %v404_v25 = vld [vmem:[#allocation5 + $0x10] sm:$0xff]  ;;  %v499_v26 = vld [vmem:[#allocation7 + $0x20] sm:$0xff] }
  0x67   : > { %924 = vmatpush3.msra.mxu0 %v414_v4  ;;  %959 = vmatpush3.msra.mxu1 %v507_v10  ;;  %v403_v27 = vld [vmem:[#allocation5 + $0x8] sm:$0xff]  ;;  %v498_v28 = vld [vmem:[#allocation7 + $0x18] sm:$0xff]  ;;  %v402_v29 = vld [vmem:[#allocation5] sm:$0xff] }
  0x68   : > { %925 = vmatprep.subr.mxu0 %v1325_v0  ;;  %960 = vmatprep.subr.mxu1 %v1325_v0  ;;  %v401_v30 = vld [vmem:[%s1504_s5] sm:$0xff]  ;;  %v496_v32 = vld [vmem:[#allocation7 + $0x8] sm:$0xff]  ;;  %v495_v33 = vld [vmem:[#allocation7] sm:$0xff]  ;;  %s1229_s5 = scalar_lea.vmem %s705_s30, 128 }
  0x69   : > { %926 = vmatpush3.msra.mxu0 %v413_v6  ;;  %961 = vmatpush3.msra.mxu1 %v506_v12  ;;  %v497_v31 = vld [vmem:[#allocation7 + $0x10] sm:$0xff]  ;;  %v611_v34 = vld [vmem:[#allocation8 + $0x78] sm:$0xff]  ;;  %v609_v36 = vld [vmem:[#allocation8 + $0x68] sm:$0xff]  ;;  %p1230_p10 = scmp.ne.s32.totalorder %s705_s30, %s1229_s5  ;;  %p1237_p6 = scmp.lt.s32.totalorder %s1235_s20, %s1229_s5 }
  0x6a   : > { %927 = vmatprep.subr.mxu0 %v1325_v0  ;;  %962 = vmatprep.subr.mxu1 %v1325_v0  ;;  %v610_v35 = vld [vmem:[#allocation8 + $0x70] sm:$0xff]  ;;  %v608_v37 = vld [vmem:[#allocation8 + $0x60] sm:$0xff]  ;;  %v607_v38 = vld [vmem:[#allocation8 + $0x58] sm:$0xff] }
  0x6b   : > { %928 = vmatpush3.msra.mxu0 %v412_v9  ;;  %963 = vmatpush3.msra.mxu1 %v505_v14  ;;  %v606_v39 = vld [vmem:[#allocation8 + $0x50] sm:$0xff]  ;;  %v605_v40 = vld [vmem:[#allocation8 + $0x48] sm:$0xff]  ;;  %v604_v41 = vld [vmem:[#allocation8 + $0x40] sm:$0xff]  ;;  %p1231_p2 = pnand %p1230_p10, %p1468_p0  ;;  %p1238_p9 = por %p1237_p6, %p1236_p7 }
  0x6c   : > { %929 = vmatprep.subr.mxu0 %v1325_v0  ;;  %964 = vmatprep.subr.mxu1 %v1325_v0  ;;  %v603_v42 = vld [vmem:[#allocation8 + $0x38] sm:$0xff]  ;;  %v602_v43 = vld [vmem:[#allocation8 + $0x30] sm:$0xff]  ;;  %v601_v44 = vld [vmem:[#allocation8 + $0x28] sm:$0xff] }
  0x6d   : > { %930 = vmatpush3.msra.mxu0 %v411_v11  ;;  %965 = vmatpush3.msra.mxu1 %v504_v16  ;;  %v600_v45 = vld [vmem:[#allocation8 + $0x20] sm:$0xff]  ;;  %v599_v46 = vld [vmem:[#allocation8 + $0x18] sm:$0xff]  ;;  %v598_v47 = vld [vmem:[#allocation8 + $0x10] sm:$0xff]  ;;  %p1232_p11 = pneg %p1231_p2 }
  0x6e   : > { %931 = vmatprep.subr.mxu0 %v1325_v0  ;;  %966 = vmatprep.subr.mxu1 %v1325_v0  ;;  %v597_v48 = vld [vmem:[#allocation8 + $0x8] sm:$0xff]  ;;  %v596_v49 = vld [vmem:[#allocation8] sm:$0xff]  ;;  %v858_v50 = vld [vmem:[%s1632_s2] ss:$0 sm:$0xff] }
  0x6f   : > { %932 = vmatpush3.msra.mxu0 %v410_v13  ;;  %967 = vmatpush3.msra.mxu1 %v503_v18  ;;  %v859_v59 = vld [vmem:[%s1634_s4] ss:$0 sm:$0xff]  ;;  %p1239_p13 = pnand %p1238_p9, %p1232_p11 }
  0x70   : > { %933 = vmatprep.subr.mxu0 %v1325_v0  ;;  %968 = vmatprep.subr.mxu1 %v1325_v0 }
  0x71   : > { %934 = vmatpush3.msra.mxu0 %v409_v15  ;;  %969 = vmatpush3.msra.mxu1 %v502_v20 }
  0x72   : > { %935 = vmatprep.subr.mxu0 %v1325_v0  ;;  %970 = vmatprep.subr.mxu1 %v1325_v0 }
  0x73   : > { %936 = vmatpush3.msra.mxu0 %v408_v17  ;;  %971 = vmatpush3.msra.mxu1 %v501_v22 }
  0x74   : > { %937 = vmatprep.subr.mxu0 %v1325_v0  ;;  %972 = vmatprep.subr.mxu1 %v1325_v0 }
  0x75   : > { %938 = vmatpush3.msra.mxu0 %v407_v19  ;;  %973 = vmatpush3.msra.mxu1 %v500_v24 }
  0x76   : > { %939 = vmatprep.subr.mxu0 %v1325_v0  ;;  %974 = vmatprep.subr.mxu1 %v1325_v0 }
  0x77   : > { %940 = vmatpush3.msra.mxu0 %v406_v21  ;;  %975 = vmatpush3.msra.mxu1 %v499_v26 }
  0x78   : > { %941 = vmatprep.subr.mxu0 %v1325_v0  ;;  %976 = vmatprep.subr.mxu1 %v1325_v0 }
  0x79   : > { %942 = vmatpush3.msra.mxu0 %v405_v23  ;;  %977 = vmatpush3.msra.mxu1 %v498_v28 }
  0x7a   : > { %943 = vmatprep.subr.mxu0 %v1325_v0  ;;  %978 = vmatprep.subr.mxu1 %v1325_v0 }
  0x7b   : > { %944 = vmatpush3.msra.mxu0 %v404_v25  ;;  %979 = vmatpush3.msra.mxu1 %v497_v31 }
  0x7c   : > { %945 = vmatprep.subr.mxu0 %v1325_v0  ;;  %980 = vmatprep.subr.mxu1 %v1325_v0 }
  0x7d   : > { %946 = vmatpush3.msra.mxu0 %v403_v27  ;;  %981 = vmatpush3.msra.mxu1 %v496_v32 }
  0x7e   : > { %947 = vmatprep.subr.mxu0 %v1325_v0  ;;  %982 = vmatprep.subr.mxu1 %v1325_v0 }
  0x7f   : > { %948 = vmatpush3.msra.mxu0 %v402_v29  ;;  %983 = vmatpush3.msra.mxu1 %v495_v33 }
  0x80   : > { %950 = vmatmul.mubr.f32.vlgmr.msra.gmra.mxu0 %v401_v30  ;;  %987 = vmatprep.subr.mxu0 %v1325_v0 }
  0x81   : > { %1019 = vmatprep.mubr.msk.f32.mxu0 %vm1326_vm0, %v1325_v0  ;;  %985 = vmatmul.mubr.f32.vlgmr.msra.gmra.mxu1 %v401_v30 }
  0x82   : > { %988 = vmatpush3.msra.mxu0 %v611_v34 }
  0x83   : > { %989 = vmatprep.subr.mxu0 %v1325_v0 }
  0x84   : > { %990 = vmatpush3.msra.mxu0 %v610_v35 }
  0x85   : > { %991 = vmatprep.subr.mxu0 %v1325_v0 }
  0x86   : > { %992 = vmatpush3.msra.mxu0 %v609_v36 }
  0x87   : > { %993 = vmatprep.subr.mxu0 %v1325_v0 }
  0x88   : > { %994 = vmatpush3.msra.mxu0 %v608_v37 }
  0x89   : > { %995 = vmatprep.subr.mxu0 %v1325_v0 }
  0x8a   : > { %996 = vmatpush3.msra.mxu0 %v607_v38 }
  0x8b   : > { %997 = vmatprep.subr.mxu0 %v1325_v0 }
  0x8c   : > { %998 = vmatpush3.msra.mxu0 %v606_v39 }
  0x8d   : > { %999 = vmatprep.subr.mxu0 %v1325_v0 }
  0x8e   : > { %1000 = vmatpush3.msra.mxu0 %v605_v40 }
  0x8f   : > { %1001 = vmatprep.subr.mxu0 %v1325_v0 }
  0x90   : > { %1002 = vmatpush3.msra.mxu0 %v604_v41 }
  0x91   : > { %1003 = vmatprep.subr.mxu0 %v1325_v0 }
  0x92   : > { %1004 = vmatpush3.msra.mxu0 %v603_v42 }
  0x93   : > { %1005 = vmatprep.subr.mxu0 %v1325_v0 }
  0x94   : > { %1006 = vmatpush3.msra.mxu0 %v602_v43 }
  0x95   : > { %1007 = vmatprep.subr.mxu0 %v1325_v0 }
  0x96   : > { %1008 = vmatpush3.msra.mxu0 %v601_v44 }
  0x97   : > { %1009 = vmatprep.subr.mxu0 %v1325_v0 }
  0x98   : > { %1010 = vmatpush3.msra.mxu0 %v600_v45 }
  0x99   : > { %1011 = vmatprep.subr.mxu0 %v1325_v0 }
  0x9a   : > { %1012 = vmatpush3.msra.mxu0 %v599_v46 }
  0x9b   : > { %1013 = vmatprep.subr.mxu0 %v1325_v0 }
  0x9c   : > { %1014 = vmatpush3.msra.mxu0 %v598_v47 }
  0x9d   : > { %1015 = vmatprep.subr.mxu0 %v1325_v0 }
  0x9e   : > { %1016 = vmatpush3.msra.mxu0 %v597_v48 }
  0x9f   : > { %1017 = vmatprep.subr.mxu0 %v1325_v0  ;;  %v861_v0 = vld [vmem:[%s1636_s6] ss:$0 sm:$0xff] }
  0xa0   : > { %1018 = vmatpush3.msra.mxu0 %v596_v49 }
 0x140   : > { %v491_v51 = vpop.f32.mrf.mxu0 }
 0x141   : > { %v492_v52 = vadd.f32 %v858_v50, %v491_v51  ;;  %v584_v55 = vpop.f32.mrf.mxu1 }
 0x142   : > { %v951_v53 = vpop.f32.mrf.mxu0  ;;  %v585_v60 = vadd.f32 %v859_v59, %v584_v55 }
 0x143   : > { %v860_v54 = vmul.f32 -1.442695, %v492_v52  ;;  %v986_v56 = vpop.f32.mrf.mxu1 }
 0x145   : > { %1119 = vpow2.f32 %v860_v54 }
 0x152   : > { %v1120_v57 = vpop.eup %1119 }
 0x153   : > { %v591_v58 = vadd.f32 1.0, %v1120_v57 }
 0x155   : > { %1121 = vrcp.f32 %v591_v58 }
 0x162   : > { %v1122_v61 = vpop.eup %1121 }
 0x163   : > { %v594_v62 = vmul.f32 %v1122_v61, %v492_v52 }
 0x165   : > { %v595_v63 = vmul.f32 %v594_v62, %v585_v60 }
 0x167   : > { %1020 = vmatmul.mubr.f32.vlgmr.msra.gmra.mxu0 %v595_v63 }
 0x227   : > { %v685_v1 = vpop.f32.mrf.mxu0 }
 0x228   : > { %v686_v2 = vadd.f32 %v861_v0, %v685_v1 }
 0x229   : > { %v1021_v3 = vpop.f32.mrf.mxu0 }
 0x22a   : > { %689 = vst [vmem:[%s393_s21] sm:$0xff] %v686_v2 }
 0x22b   : > { %1242 = shalt.err (!%p1239_p13)
}
 0x22c   : > { %s1243_s3 = scalar_lea.hbm %s1588_s22, 128  ;;  %s1247_s11 = scalar_lea.hbm %s1637_s7, 256 }
 0x22d   : > { %p1244_p1 = scmp.ne.s32.totalorder %s1588_s22, %s1243_s3  ;;  %p1248_p12 = scmp.lt.s32.totalorder %s1588_s22, %s1637_s7 }
 0x22e   : > { %p1249_p5 = scmp.lt.s32.totalorder %s1247_s11, %s1243_s3 }
 0x22f   : > { %p1245_p4 = pnand %p1244_p1, %p1468_p0 }
 0x230   : > { %p1250_p3 = por %p1249_p5, %p1248_p12 }
 0x231   : > { %p1246_p8 = pneg %p1245_p4 }
 0x233   : > { %p1251_p10 = pnand %p1250_p3, %p1246_p8 }
 0x235   : > { %1254 = shalt.err (!%p1251_p10)
}
 0x236   : > { %1036 = dma.vmem_to_hbm [thread:$0]  (%p1468_p0), %s705_s30, 128, %s1588_s22, %s691_s19  }
 0x237 PF: > { %s716_s10 = sand.u32 1, %s1297_s24   ;;  %p1659_p2 = scmp.ne.s32.totalorder %s1648_s12, 0 }
 0x238   : > { %p1660_p11 = scmp.ge.s32.totalorder %s1317_s29, 2  ;;  %s717_s21 = scalar_lea.sflag [#allocation4], %s716_s10 }
 0x23a   : > { %p1053_p7 = pnand %p1660_p11, %p1659_p2 }
 0x23c   : > { %p1054_p6 = pneg %p1053_p7 }
 0x23e   : > { %1292 = dma.done.wait (%p1054_p6), %s717_s21, 128  }
 0x23f   : > { %1294 = vsyncadd (%p1054_p6), %s717_s21, 4294967168  ;;  %s25_s29 = sadd.s32 1, %s1317_s29   ;;  %s1661_s24 = smov %s1301_s25 }
 0x240   : > { %p22_p9 = scmp.ge.s32.totalorder %s25_s29, 4   ;;  %s1662_s25 = smov %s1305_s26 }
 0x241   : > { %s1663_s26 = smov %s1480_s23  ;;  %s1664_s27 = smov %s1313_s28 }
 0x242   : > { %s1665_s28 = smov %s1667_s8  ;;  %24 = sbr.rel (!%p22_p9) target bundleno = 12 (0xc), region = 114 }
 0x247   :  { %722 = vsyncpa [#allocation3], 1 }
 0x248   :  { %724 = vsyncpa [#allocation3 + $0x1], 1 }
 0x249   :  { %725 = vsyncpa [#allocation6], 1 }
 0x24a   :  { %726 = vsyncpa [#allocation9], 1 }
 0x24b   :  { %727 = vsyncpa [#allocation4], 1 }
 0x24c   :  { %729 = vsyncpa [#allocation4 + $0x1], 1 }

</bundles_post_ra>
